<compile_context>
chip_gen: v7x
topology: tpu7x:2x2x1
jax: 0.10.0
libtpu: 0.0.40
codegen_flags: <defaults>
</compile_context>

<pallas_src>
import jax
import jax.numpy as jnp
from jax.experimental import pallas as pl
from jax.experimental.pallas import tpu as pltpu


def _depth_to_space_kernel(sel_ref, x_ref, o_ref, xcat_ref):
    # sel_ref:  (b*W, b*W)      one-hot lane-interleave selector (input dtype)
    # x_ref:    (1, b^2, TR, W) one row-tile of the channel-grouped input
    # o_ref:    (1, TR, b^2*W)  lane-dense output slab for the same rows
    # xcat_ref: (TR, b*W)       VMEM staging buffer (K-concat of one i-slice)
    W = x_ref.shape[3]
    bw = sel_ref.shape[0]
    b = bw // W
    for i in range(b):                                   # static, tiny (<= 4)
        # Stage the b planes of slice i side-by-side along lanes (K-concat).
        for j in range(b):
            xcat_ref[:, j * W:(j + 1) * W] = x_ref[0, i * b + j]
        # Single selection matmul per slice; result goes straight to its
        # contiguous output lane range — no accumulator, no VPU adds.
        o_ref[0, :, i * bw:(i + 1) * bw] = jnp.dot(
            xcat_ref[...], sel_ref[...],
            preferred_element_type=jnp.float32).astype(o_ref.dtype)


def _build_selector(block_size, width, dtype):
    """sel[j*W + w, w*b + j] = 1, else 0.  Shape (b*W, b*W)."""
    b, W = block_size, width
    bw = b * W
    p = jnp.arange(bw, dtype=jnp.int32)[:, None]   # K index: p = j*W + w
    m = jnp.arange(bw, dtype=jnp.int32)[None, :]   # N index: m = w*b + j
    j = p // W
    w = p % W
    return (m == w * b + j).astype(dtype)


def _ceil_to(v, m):
    return -(-v // m) * m


def _choose_row_tile(R, per_row_bytes, pack, force_split,
                     block_budget=4 * 1024 * 1024):
    """Largest row tile (multiple of `pack`) whose in+out blocks fit the budget.

    The grid uses pl.cdiv, so the tile need not divide R (ragged last tile is
    masked by Pallas).  If `force_split` (batch == 1), cap the tile near R/2 so
    the grid has >= 2 programs for the two v7x TensorCores.
    """
    tr = max(pack, (block_budget // max(per_row_bytes, 1)) // pack * pack)
    if force_split and R > pack:
        tr = min(tr, _ceil_to((R + 1) // 2, pack))
    if tr >= R:
        return R            # full extent: always layout-legal
    return tr               # multiple of the sublane pack


def depth_to_space(x, block_size):
    """NCHW depth-to-space (TF/DCR ordering) via a Pallas TPU kernel."""
    B, C, H, W = x.shape
    b = int(block_size)
    bsq = b * b
    assert C % bsq == 0, "channels must be divisible by block_size**2"
    assert jnp.issubdtype(x.dtype, jnp.floating), (
        "float dtypes only (MXU one-hot selection path)")  # TODO(synk): ints
    cout = C // bsq
    R = cout * H                 # merged (d, h) row dimension
    bw = b * W                   # per-slice output lane width
    N = bsq * W                  # lane-dense output row width
    itemsize = jnp.dtype(x.dtype).itemsize
    pack = max(8, 32 // itemsize)        # sublane pack: 8 f32 / 16 bf16 / 32 i8

    # Free, contiguous reshape: x[n, k*cout + d, h, w] -> xr[n, k, d*H + h, w]
    xr = x.reshape(B, bsq, R, W)
    sel = _build_selector(b, W, x.dtype)

    per_row_bytes = 2 * bsq * W * itemsize           # input + output per row
    TR = _choose_row_tile(R, per_row_bytes, pack, force_split=(B == 1))
    grid = (B, pl.cdiv(R, TR))

    # Explicit VMEM budget: 2x double-buffered in/out blocks + 2x selector
    # + staging buffer + f32 dot-result streaming headroom.
    in_block = bsq * TR * W * itemsize
    out_block = TR * N * itemsize
    sel_bytes = bw * bw * itemsize
    stage_bytes = TR * bw * itemsize
    stream_bytes = TR * bw * 4
    vmem_limit = (2 * (in_block + out_block) + 2 * sel_bytes
                  + stage_bytes + stream_bytes + (2 << 20))
    vmem_limit = int(max(min(vmem_limit, 64 << 20), 16 << 20))

    out3 = pl.pallas_call(
        _depth_to_space_kernel,
        out_shape=jax.ShapeDtypeStruct((B, R, N), x.dtype),
        grid=grid,
        in_specs=[
            # Selector: constant index_map -> fetched into VMEM once.
            pl.BlockSpec((bw, bw), lambda n, t: (0, 0)),
            pl.BlockSpec((1, bsq, TR, W), lambda n, t: (n, 0, t, 0)),
        ],
        out_specs=pl.BlockSpec((1, TR, N), lambda n, t: (n, t, 0)),
        scratch_shapes=[pltpu.VMEM((TR, bw), x.dtype)],
        compiler_params=pltpu.CompilerParams(
            dimension_semantics=("parallel", "parallel"),
            vmem_limit_bytes=vmem_limit),
    )(sel, xr)

    # Free, contiguous reshape: out3[n, d*H + h, i*b*W + w*b + j]
    #                           -> out[n, d, h*b + i, w*b + j]
    return out3.reshape(B, cout, H * b, W * b)


def depth_to_space_ref(x, block_size):
    """Pure-JAX reference mirroring the PyTorch module's forward."""
    B, C, H, W = x.shape
    b = block_size
    cout = C // (b * b)
    x6 = x.reshape(B, b, b, cout, H, W)            # c = (i*b + j)*cout + d
    x6 = jnp.transpose(x6, (0, 3, 4, 1, 5, 2))     # (B, d, h, i, w, j)
    return x6.reshape(B, cout, H * b, W * b)


if __name__ == "__main__":
    key = jax.random.PRNGKey(0)

    # Main case (module hyperparameter block_size=2, no weights).
    block_size = 2
    B, C, H, W = 2, 8, 16, 16                      # Cout = 2
    x = jax.random.normal(key, (B, C, H, W), dtype=jnp.float32)
    out = jax.block_until_ready(depth_to_space(x, block_size))
    expected = depth_to_space_ref(x, block_size)
    assert out.shape == (B, C // (block_size ** 2), H * block_size, W * block_size)
    assert out.dtype == x.dtype
    assert jnp.allclose(out, expected, atol=1e-6, rtol=1e-6), "mismatch vs reference"

    # Second case: batch=1 (forces the v7x two-core row split), lane-dense
    # output (b*W = 128), ragged cdiv row tiles (R=88, TR=48).
    k2 = jax.random.PRNGKey(1)
    x2 = jax.random.normal(k2, (1, 4, 88, 64), dtype=jnp.float32)
    out2 = jax.block_until_ready(depth_to_space(x2, 2))
    exp2 = depth_to_space_ref(x2, 2)
    assert out2.shape == (1, 1, 176, 128)
    assert jnp.allclose(out2, exp2, atol=1e-6, rtol=1e-6), "mismatch vs reference (case 2)"

    print("KERNEL_OK")
</pallas_src>

<mosaic_0001>
module attributes {stable_mosaic.version = 11 : i64} {
  func.func @_depth_to_space_kernel(%arg0: i32, %arg1: i32, %arg2: memref<32x32xf32, #tpu.memory_space<vmem>>, %arg3: memref<1x4x32x16xf32, #tpu.memory_space<vmem>>, %arg4: memref<1x32x64xf32, #tpu.memory_space<vmem>>, %arg5: memref<32x32xf32, #tpu.memory_space<vmem>>) attributes {dimension_semantics = [#tpu.dimension_semantics<parallel>, #tpu.dimension_semantics<parallel>], iteration_bounds = array<i64: 2, 1>, scalar_prefetch = 0 : i64, scratch_operands = 1 : i64, tpu.core_type = #tpu.core_type<tc>, window_params = [{pipeline_mode = #tpu.pipeline_mode<synchronous>, transform_indices = @transform_0, window_bounds = array<i64: 32, 32>}, {transform_indices = @transform_1, window_bounds = array<i64: 1, 4, 32, 16>}, {transform_indices = @transform_2, window_bounds = array<i64: 1, 32, 64>}]} {
    %c0 = arith.constant 0 : index
    %c0_0 = arith.constant 0 : index
    %c0_1 = arith.constant 0 : index
    %c0_2 = arith.constant 0 : index
    %0 = vector.load %arg3[%c0, %c0_0, %c0_1, %c0_2] : memref<1x4x32x16xf32, #tpu.memory_space<vmem>>, vector<1x1x32x16xf32>
    %1 = vector.shape_cast %0 : vector<1x1x32x16xf32> to vector<32x16xf32>
    %c0_3 = arith.constant 0 : index
    %c0_4 = arith.constant 0 : index
    %2 = vector.load %arg5[%c0_3, %c0_4] : memref<32x32xf32, #tpu.memory_space<vmem>>, vector<32x16xf32>
    tpu.vector_store %arg5[%c0_3, %c0_4], %1 {strides = array<i32>} : memref<32x32xf32, #tpu.memory_space<vmem>>, vector<32x16xf32>,
    %c0_5 = arith.constant 0 : index
    %c1 = arith.constant 1 : index
    %c0_6 = arith.constant 0 : index
    %c0_7 = arith.constant 0 : index
    %3 = vector.load %arg3[%c0_5, %c1, %c0_6, %c0_7] : memref<1x4x32x16xf32, #tpu.memory_space<vmem>>, vector<1x1x32x16xf32>
    %4 = vector.shape_cast %3 : vector<1x1x32x16xf32> to vector<32x16xf32>
    %c0_8 = arith.constant 0 : index
    %c16 = arith.constant 16 : index
    %5 = vector.load %arg5[%c0_8, %c16] : memref<32x32xf32, #tpu.memory_space<vmem>>, vector<32x16xf32>
    tpu.vector_store %arg5[%c0_8, %c16], %4 {strides = array<i32>} : memref<32x32xf32, #tpu.memory_space<vmem>>, vector<32x16xf32>,
    %c0_9 = arith.constant 0 : index
    %c0_10 = arith.constant 0 : index
    %6 = vector.load %arg5[%c0_9, %c0_10] : memref<32x32xf32, #tpu.memory_space<vmem>>, vector<32x32xf32>
    %c0_11 = arith.constant 0 : index
    %c0_12 = arith.constant 0 : index
    %7 = vector.load %arg2[%c0_11, %c0_12] : memref<32x32xf32, #tpu.memory_space<vmem>>, vector<32x32xf32>
    %cst = arith.constant dense<0.000000e+00> : vector<32x32xf32>
    %8 = tpu.matmul %6, %7, %cst {dimension_numbers = #tpu.dot_dimension_numbers<[1], [0], [0], [1], [0, 0, 1, 1], [], []>} : vector<32x32xf32>, vector<32x32xf32>, vector<32x32xf32> -> vector<32x32xf32>
    %c0_13 = arith.constant 0 : index
    %c0_14 = arith.constant 0 : index
    %c0_15 = arith.constant 0 : index
    %9 = vector.load %arg4[%c0_13, %c0_14, %c0_15] : memref<1x32x64xf32, #tpu.memory_space<vmem>>, vector<1x32x32xf32>
    %10 = vector.shape_cast %9 : vector<1x32x32xf32> to vector<32x32xf32>
    %11 = vector.shape_cast %8 : vector<32x32xf32> to vector<1x32x32xf32>
    tpu.vector_store %arg4[%c0_13, %c0_14, %c0_15], %11 {strides = array<i32>} : memref<1x32x64xf32, #tpu.memory_space<vmem>>, vector<1x32x32xf32>,
    %c0_16 = arith.constant 0 : index
    %c2 = arith.constant 2 : index
    %c0_17 = arith.constant 0 : index
    %c0_18 = arith.constant 0 : index
    %12 = vector.load %arg3[%c0_16, %c2, %c0_17, %c0_18] : memref<1x4x32x16xf32, #tpu.memory_space<vmem>>, vector<1x1x32x16xf32>
    %13 = vector.shape_cast %12 : vector<1x1x32x16xf32> to vector<32x16xf32>
    %c0_19 = arith.constant 0 : index
    %c0_20 = arith.constant 0 : index
    %14 = vector.load %arg5[%c0_19, %c0_20] : memref<32x32xf32, #tpu.memory_space<vmem>>, vector<32x16xf32>
    tpu.vector_store %arg5[%c0_19, %c0_20], %13 {strides = array<i32>} : memref<32x32xf32, #tpu.memory_space<vmem>>, vector<32x16xf32>,
    %c0_21 = arith.constant 0 : index
    %c3 = arith.constant 3 : index
    %c0_22 = arith.constant 0 : index
    %c0_23 = arith.constant 0 : index
    %15 = vector.load %arg3[%c0_21, %c3, %c0_22, %c0_23] : memref<1x4x32x16xf32, #tpu.memory_space<vmem>>, vector<1x1x32x16xf32>
    %16 = vector.shape_cast %15 : vector<1x1x32x16xf32> to vector<32x16xf32>
    %c0_24 = arith.constant 0 : index
    %c16_25 = arith.constant 16 : index
    %17 = vector.load %arg5[%c0_24, %c16_25] : memref<32x32xf32, #tpu.memory_space<vmem>>, vector<32x16xf32>
    tpu.vector_store %arg5[%c0_24, %c16_25], %16 {strides = array<i32>} : memref<32x32xf32, #tpu.memory_space<vmem>>, vector<32x16xf32>,
    %c0_26 = arith.constant 0 : index
    %c0_27 = arith.constant 0 : index
    %18 = vector.load %arg5[%c0_26, %c0_27] : memref<32x32xf32, #tpu.memory_space<vmem>>, vector<32x32xf32>
    %c0_28 = arith.constant 0 : index
    %c0_29 = arith.constant 0 : index
    %19 = vector.load %arg2[%c0_28, %c0_29] : memref<32x32xf32, #tpu.memory_space<vmem>>, vector<32x32xf32>
    %cst_30 = arith.constant dense<0.000000e+00> : vector<32x32xf32>
    %20 = tpu.matmul %18, %19, %cst_30 {dimension_numbers = #tpu.dot_dimension_numbers<[1], [0], [0], [1], [0, 0, 1, 1], [], []>} : vector<32x32xf32>, vector<32x32xf32>, vector<32x32xf32> -> vector<32x32xf32>
    %c0_31 = arith.constant 0 : index
    %c0_32 = arith.constant 0 : index
    %c32 = arith.constant 32 : index
    %21 = vector.load %arg4[%c0_31, %c0_32, %c32] : memref<1x32x64xf32, #tpu.memory_space<vmem>>, vector<1x32x32xf32>
    %22 = vector.shape_cast %21 : vector<1x32x32xf32> to vector<32x32xf32>
    %23 = vector.shape_cast %20 : vector<32x32xf32> to vector<1x32x32xf32>
    tpu.vector_store %arg4[%c0_31, %c0_32, %c32], %23 {strides = array<i32>} : memref<1x32x64xf32, #tpu.memory_space<vmem>>, vector<1x32x32xf32>,
    return
  }
  func.func @transform_0(%arg0: i32, %arg1: i32) -> (i32, i32) {
    %c0_i32 = arith.constant 0 : i32
    %c0_i32_0 = arith.constant 0 : i32
    %c0_i32_1 = arith.constant 0 : i32
    return %c0_i32, %c0_i32_0 : i32, i32
  }
  func.func @transform_1(%arg0: i32, %arg1: i32) -> (i32, i32, i32, i32) {
    %c0_i32 = arith.constant 0 : i32
    %c0_i32_0 = arith.constant 0 : i32
    %c0_i32_1 = arith.constant 0 : i32
    return %arg0, %c0_i32, %arg1, %c0_i32_0 : i32, i32, i32, i32
  }
  func.func @transform_2(%arg0: i32, %arg1: i32) -> (i32, i32, i32) {
    %c0_i32 = arith.constant 0 : i32
    %c0_i32_0 = arith.constant 0 : i32
    return %arg0, %arg1, %c0_i32 : i32, i32, i32
  }
}

</mosaic_0001>

<bundles_post_ra>
// kernel: tpu_custom_call.1
= control target key start
LH: loop header
LB: loop body
LE: loop exit
PB: predicated region body
PF: predicated region fallthrough
CT: control target
= control target key end

     0   :  { %7 = vsyncpa [#allocation4], 0  ;;  %s1004_s0 = inlined_call_operand.vmem [shape: f32[32,32], index: 0, kind: input, shape index: {}]   ;;  %s1005_s1 = inlined_call_operand.vmem [shape: f32[2,4,32,16], index: 1, kind: input, shape index: {}]   ;;  %s1006_s2 = inlined_call_operand.hbm [shape: f32[2,32,64], index: 2, kind: output, shape index: {}]  }
   0x1   :  { %9 = vsyncpa [#allocation4 + $0x1], 0  ;;  %s827_s9 = smov 0   ;;  %s829_s10 = smov 0  }
   0x2   :  { %s831_s11 = smov 0   ;;  %s833_s12 = smov 0  }
   0x3   :  { %s835_s13 = smov 0   ;;  %s837_s14 = smov 0  }
   0x4 LB: > { %s573_s15 = sadd.s32 4294967295, %s805_s14   ;;  %s574_s16 = sadd.s32 4294967294, %s805_s14   ;;  %s805_s14 = sphi %s837_s14, %s15_s14   ;;  %s801_s13 = sphi %s835_s13, %s1013_s13   ;;  %s797_s12 = sphi %s833_s12, %s1012_s12   ;;  %s793_s11 = sphi %s831_s11, %s1011_s11   ;;  %s789_s10 = sphi %s829_s10, %s1010_s10   ;;  %s785_s9 = sphi %s827_s9, %s1009_s9  }
   0x5   : > { %s27_s17 = sadd.s32 1, %s801_s13  ;;  %s85_s18 = sadd.s32 1, %s793_s11 }
   0x6   : > { %p29_p0 = scmp.ge.s32.totalorder %s27_s17, 2  ;;  %p95_p1 = scmp.ne.s32.totalorder %s793_s11, %s789_s10 }
   0x7   : > { %p96_p2 = scmp.eq.s32.totalorder %s573_s15, 1  ;;  %p101_p3 = scmp.ne.s32.totalorder %s789_s10, %s785_s9 }
   0x8   : > { %s1015_s17 = smov (%p29_p0, %s27_s17), 0  ;;  %p102_p5 = scmp.eq.s32.totalorder %s574_s16, 1 }
   0x9   : > { %p867_p4 = por %p96_p2, %p95_p1  ;;  %s80_s20 = ssub.s32 %s801_s13, %s1015_s17 }
   0xa   : > { %p577_p6 = scmp.ge.s32.totalorder %s805_s14, 1  ;;  %p83_p7 = scmp.eq.s32.totalorder %s80_s20, 0 }
   0xb   : > { %p874_p8 = por %p102_p5, %p101_p3  ;;  %p136_p9 = scmp.lt.s32.totalorder %s805_s14, 3 }
   0xc   : > { %s880_s22 = scalar_select %p83_p7, %s793_s11, %s85_s18  }
   0xd   : > { %p137_p10 = pnand %p577_p6, %p136_p9 }
   0xe   : > { %p163_p11 = scmp.lt.s32.totalorder (!%p137_p10), %s797_s12, 1  ;;  %v212_v0 = vld [vmem:[%s1004_s0] sm:$0xff] (!%p137_p10)  ;;  %v213_v1 = vld [vmem:[%s1004_s0 + $0x8] sm:$0xff] (!%p137_p10)  ;;  %v214_v3 = vld [vmem:[%s1004_s0 + $0x10] sm:$0xff] (!%p137_p10)  ;;  %s807_s8 = smov (!%p137_p10), 16   ;;  %vm177_vm0 = vcmask (!%p137_p10), 130048  }
   0xf   : > { %140 = sbr.rel (%p137_p10) target bundleno = 510 (0x1fe), region = 28  ;;  %v652_v2 = vpack.c.bf16 (!%p137_p10), %v213_v1, %v212_v0  ;;  %v215_v4 = vld [vmem:[%s1004_s0 + $0x18] sm:$0xff] (!%p137_p10)  ;;  %vm203_vm1 = vcmask (!%p137_p10), 261248   ;;  %vm216_vm2 = vcmask (!%p137_p10), 261120   ;;  %s159_s15 = sand.u32 (!%p137_p10), 1, %s789_s10   ;;  %vm473_vm3 = vcmask (!%p137_p10), 523520  }
  0x10   : > { %v656_v5 = vpack.c.bf16 (!%p137_p10), %v215_v4, %v214_v3  ;;  %s578_s16 = sshll.u32 (!%p137_p10), %s159_s15, 5  ;;  %s808_s20 = smov (!%p137_p10), 32  }
  0x11   : > { %653 = vmatprep.subr.bf16.mxu0 (!%p137_p10), %v652_v2  ;;  %661 = vmatprep.subr.bf16.mxu1 (!%p137_p10), %v652_v2  ;;  %s161_s18 = scalar_lea.vmem (!%p137_p10), [#allocation3], %s578_s16  ;;  %s607_s23 = sshll.u32 (!%p137_p10), %s797_s12, 9 }
  0x12   : > { %655 = vmatpush3.bf16.msra.mxu0 (!%p137_p10), %v652_v2  ;;  %663 = vmatpush3.bf16.msra.mxu1 (!%p137_p10), %v652_v2  ;;  %s494_s24 = sshll.u32 (!%p137_p10), %s161_s18, 4  ;;  %s952_s27 = scalar_lea.hbm (!%p137_p10), %s1006_s2, %s607_s23  ;;  %s954_s24 = int_to_ptr.vmem [resolvable:$true] %s494_s24 }
  0x13   : > { %657 = vmatprep.subr.bf16.mxu0 (!%p137_p10), %v656_v5  ;;  %665 = vmatprep.subr.bf16.mxu1 (!%p137_p10), %v656_v5  ;;  %s727_s28 = scalar_lea.vmem (!%p137_p10), %s954_s24, 512  ;;  %s809_s29 = smov (!%p137_p10), [#allocation3]  }
  0x14   : > { %p728_p12 = scmp.ne.s32.totalorder (!%p137_p10), %s954_s24, %s727_s28  ;;  %s731_s30 = sshll.u32 (!%p137_p10), %s809_s29, 4  ;;  %s732_s30 = int_to_ptr.vmem [resolvable:$false] %s731_s30 }
  0x15   : > { %p734_p1 = scmp.lt.s32.totalorder (!%p137_p10), %s954_s24, %s732_s30 }
  0x16   : > { %s164_s3 = scalar_select %p163_p11, %s797_s12, 1  ;;  %659 = vmatpush3.bf16.msra.mxu0 %v656_v5  ;;  %667 = vmatpush3.bf16.msra.mxu1 %v656_v5 }
  0x17   : > { %s958_s12 = scalar_lea.sflag [#allocation4], %s159_s15  ;;  %p729_p13 = pnand %p728_p12, %p867_p4 }
  0x18   : > { %s606_s4 = sshll.u32 %s164_s3, 7  ;;  %s733_s3 = scalar_lea.vmem %s732_s30, 1024 }
  0x19   : > { %s899_s7 = scalar_lea.vmem %s1005_s1, %s606_s4  ;;  %p730_p0 = pneg %p729_p13 }
  0x1a   : > { %v581_v6 = vld [vmem:[%s899_s7 + $0x20] sm:$0xff]  ;;  %v583_v7 = vld [vmem:[%s899_s7 + $0x30] sm:$0xff]  ;;  %v582_v8 = vld [vmem:[%s899_s7 + $0x28] sm:$0xff]  ;;  %p735_p2 = scmp.lt.s32.totalorder %s733_s3, %s727_s28 }
  0x1b   : > { %191 = vrot.lane.b32.xlu0 %v581_v6, %s807_s8  ;;  %195 = vrot.lane.b32.xlu1 %v583_v7, %s807_s8  ;;  %v584_v9 = vld [vmem:[%s899_s7 + $0x38] sm:$0xff]  ;;  %v173_v10 = vld [vmem:[%s899_s7] sm:$0xff] }
  0x1c   : > { %v175_v11 = vld [vmem:[%s899_s7 + $0x10] sm:$0xff]  ;;  %v174_v12 = vld [vmem:[%s899_s7 + $0x8] sm:$0xff]  ;;  %178 = vst.msk [vmem:[#allocation2] sm:$0xff] %vm177_vm0, %v173_v10  ;;  %v176_v13 = vld [vmem:[%s899_s7 + $0x18] sm:$0xff]  ;;  %p736_p3 = por %p735_p2, %p734_p1 }
  0x1d   : > { %180 = vst.msk [vmem:[#allocation2 + $0x10] sm:$0xff] %vm177_vm0, %v175_v11  ;;  %179 = vst.msk [vmem:[#allocation2 + $0x8] sm:$0xff] %vm177_vm0, %v174_v12  ;;  %v593_v14 = vld [vmem:[%s899_s7 + $0x60] sm:$0xff]  ;;  %v594_v15 = vld [vmem:[%s899_s7 + $0x68] sm:$0xff] }
  0x1e   : > { %181 = vst.msk [vmem:[#allocation2 + $0x18] sm:$0xff] %vm177_vm0, %v176_v13  ;;  %v595_v16 = vld [vmem:[%s899_s7 + $0x70] sm:$0xff]  ;;  %v596_v17 = vld [vmem:[%s899_s7 + $0x78] sm:$0xff]  ;;  %v589_v22 = vld [vmem:[%s899_s7 + $0x40] sm:$0xff]  ;;  %p737_p5 = pnand %p736_p3, %p730_p0 }
  0x1f   : > { %193 = vrot.lane.b32.xlu0 %v582_v8, %s807_s8  ;;  %197 = vrot.lane.b32.xlu1 %v584_v9, %s807_s8  ;;  %v591_v23 = vld [vmem:[%s899_s7 + $0x50] sm:$0xff]  ;;  %v590_v28 = vld [vmem:[%s899_s7 + $0x48] sm:$0xff] }
  0x20   : > { %v592_v29 = vld [vmem:[%s899_s7 + $0x58] sm:$0xff] }
  0x23   : > { %336 = vrot.lane.b32.xlu0 %v593_v14, %s807_s8  ;;  %338 = vrot.lane.b32.xlu1 %v594_v15, %s807_s8 }
  0x27   : > { %340 = vrot.lane.b32.xlu0 %v595_v16, %s807_s8  ;;  %342 = vrot.lane.b32.xlu1 %v596_v17, %s807_s8 }
  0x8d   : > { %v192_v18 = vpop.permute.xlu0 %191  ;;  %v196_v19 = vpop.permute.xlu1 %195 }
  0x8e   : > { %204 = vst.msk [vmem:[#allocation2] sm:$0xff] %vm203_vm1, %v192_v18  ;;  %206 = vst.msk [vmem:[#allocation2 + $0x10] sm:$0xff] %vm203_vm1, %v196_v19 }
  0x91   : > { %v194_v20 = vpop.permute.xlu0 %193  ;;  %v198_v21 = vpop.permute.xlu1 %197 }
  0x92   : > { %205 = vst.msk [vmem:[#allocation2 + $0x8] sm:$0xff] %vm203_vm1, %v194_v20  ;;  %207 = vst.msk [vmem:[#allocation2 + $0x18] sm:$0xff] %vm203_vm1, %v198_v21 }
  0x95   : > { %v208_v24 = vld [vmem:[#allocation2] sm:$0xff]  ;;  %v337_v25 = vpop.permute.xlu0 %336  ;;  %v339_v26 = vpop.permute.xlu1 %338  ;;  %v210_v27 = vld [vmem:[#allocation2 + $0x10] sm:$0xff] }
  0x96   : > { %632 = vmatprep.mubr.msk.f32.mxu0 %vm216_vm2, %v208_v24  ;;  %323 = vst.msk [vmem:[#allocation2] sm:$0xff] %vm177_vm0, %v589_v22  ;;  %325 = vst.msk [vmem:[#allocation2 + $0x10] sm:$0xff] %vm177_vm0, %v591_v23 }
  0x97   : > { %348 = vst.msk [vmem:[#allocation2] sm:$0xff] %vm203_vm1, %v337_v25 }
  0x99   : > { %v209_v30 = vld [vmem:[#allocation2 + $0x8] sm:$0xff]  ;;  %v341_v31 = vpop.permute.xlu0 %340  ;;  %v343_v32 = vpop.permute.xlu1 %342  ;;  %v211_v33 = vld [vmem:[#allocation2 + $0x18] sm:$0xff] }
  0x9a   : > { %324 = vst.msk [vmem:[#allocation2 + $0x8] sm:$0xff] %vm177_vm0, %v590_v28  ;;  %633 = vmatmul.mubr.msk.f32.vlgmr.msra.gmra.mrb[0].mxu0 %vm216_vm2, %v209_v30  ;;  %326 = vst.msk [vmem:[#allocation2 + $0x18] sm:$0xff] %vm177_vm0, %v592_v29 }
  0x9b   : > { %350 = vst.msk [vmem:[#allocation2 + $0x10] sm:$0xff] %vm203_vm1, %v341_v31  ;;  %349 = vst.msk [vmem:[#allocation2 + $0x8] sm:$0xff] %vm203_vm1, %v339_v26  ;;  %635 = vmatprep.mubr.msk.f32.mxu0 %vm216_vm2, %v210_v27 }
  0x9c   : > { %351 = vst.msk [vmem:[#allocation2 + $0x18] sm:$0xff] %vm203_vm1, %v343_v32 }
  0x9e   : > { %636 = vmatmul.mubr.msk.f32.gmra.mrb[2].mxu0 %vm216_vm2, %v211_v33  ;;  %v352_v34 = vld [vmem:[#allocation2] sm:$0xff] }
  0x9f   : > { %646 = vmatprep.mubr.msk.f32.mxu1 %vm216_vm2, %v352_v34 }
  0xa2   : > { %v354_v35 = vld [vmem:[#allocation2 + $0x10] sm:$0xff]  ;;  %v353_v36 = vld [vmem:[#allocation2 + $0x8] sm:$0xff] }
  0xa3   : > { %647 = vmatmul.mubr.msk.f32.vlgmr.msra.gmra.mrb[0].mxu1 %vm216_vm2, %v353_v36  ;;  %v355_v37 = vld [vmem:[#allocation2 + $0x18] sm:$0xff] }
  0xa4   : > { %649 = vmatprep.mubr.msk.f32.mxu1 %vm216_vm2, %v354_v35 }
  0xa7   : > { %650 = vmatmul.mubr.msk.f32.gmra.mrb[2].mxu1 %vm216_vm2, %v355_v37 }
 0x16d   : > { %v634_v38 = vpop.f32.mrb[0].mxu0 }
 0x16e   : > { %315 = vst.msk [vmem:[%s161_s18 + $0x8] sm:$0xff] %vm216_vm2, %v634_v38  ;;  %v295_v39 = vpop.f32.mrb[1].mxu0 }
 0x16f   : > { %314 = vst.msk [vmem:[%s161_s18] sm:$0xff] %vm216_vm2, %v295_v39 }
 0x171   : > { %v637_v40 = vpop.f32.mrb[2].mxu0 }
 0x172   : > { %317 = vst.msk [vmem:[%s161_s18 + $0x18] sm:$0xff] %vm216_vm2, %v637_v40  ;;  %v305_v41 = vpop.f32.mrb[3].mxu0 }
 0x173   : > { %316 = vst.msk [vmem:[%s161_s18 + $0x10] sm:$0xff] %vm216_vm2, %v305_v41 }
 0x176   : > { %v648_v42 = vpop.f32.mrb[0].mxu1 }
 0x177   : > { %463 = vrot.lane.b32.xlu1 %v648_v42, %s808_s20  ;;  %v438_v43 = vpop.f32.mrb[1].mxu1 }
 0x178   : > { %461 = vrot.lane.b32.xlu0 %v438_v43, %s808_s20 }
 0x17a   : > { %v651_v44 = vpop.f32.mrb[2].mxu1 }
 0x17b   : > { %467 = vrot.lane.b32.xlu1 %v651_v44, %s808_s20  ;;  %v448_v45 = vpop.f32.mrb[3].mxu1 }
 0x17c   : > { %465 = vrot.lane.b32.xlu0 %v448_v45, %s808_s20 }
 0x1e9   : > { %v464_v46 = vpop.permute.xlu1 %463 }
 0x1ea   : > { %475 = vst.msk [vmem:[%s161_s18 + $0x8] sm:$0xff] %vm473_vm3, %v464_v46  ;;  %v462_v47 = vpop.permute.xlu0 %461 }
 0x1eb   : > { %474 = vst.msk [vmem:[%s161_s18] sm:$0xff] %vm473_vm3, %v462_v47 }
 0x1ed   : > { %v468_v48 = vpop.permute.xlu1 %467 }
 0x1ee   : > { %477 = vst.msk [vmem:[%s161_s18 + $0x18] sm:$0xff] %vm473_vm3, %v468_v48  ;;  %v466_v49 = vpop.permute.xlu0 %465 }
 0x1ef   : > { %476 = vst.msk [vmem:[%s161_s18 + $0x10] sm:$0xff] %vm473_vm3, %v466_v49 }
 0x1f0   : > { %740 = shalt.err (!%p737_p5)
}
 0x1f1   : > { %s741_s4 = scalar_lea.hbm %s952_s27, 512  ;;  %s745_s7 = scalar_lea.hbm %s1006_s2, 1024 }
 0x1f2   : > { %p742_p6 = scmp.ne.s32.totalorder %s952_s27, %s741_s4  ;;  %p746_p10 = scmp.lt.u32.totalorder %s952_s27, %s1006_s2 }
 0x1f3   : > { %p747_p11 = scmp.lt.u32.totalorder %s745_s7, %s741_s4  ;;  %p749_p13 = scmp.lt.u32.totalorder %s741_s4, %s952_s27 }
 0x1f4   : > { %p743_p7 = pnand %p742_p6, %p867_p4 }
 0x1f5   : > { %p748_p12 = por %p747_p11, %p746_p10 }
 0x1f6   : > { %p744_p9 = pneg %p743_p7 }
 0x1f7   : > { %p750_p0 = por %p749_p13, %p748_p12 }
 0x1f9   : > { %p751_p1 = pnand %p750_p0, %p744_p9 }
 0x1fb   : > { %754 = shalt.err (!%p751_p1)
}
 0x1fc   : > { %s810_s16 = smov 128   ;;  %s811_s18 = smov 8  }
 0x1fd   : > { %668 = dma.vmem_to_hbm [thread:$0]  (%p867_p4), %s954_s24, 512, %s952_s27, %s958_s12, %s810_s16, %s810_s16, %s811_s18  }
 0x1fe PF: > { %p674_p2 = scmp.ge.s32.totalorder %s805_s14, 2  ;;  %s509_s20 = sand.u32 1, %s785_s9  }
 0x1ff   : > { %s510_s23 = scalar_lea.sflag [#allocation4], %s509_s20 }
 0x200   : > { %p671_p3 = pnand %p674_p2, %p874_p8 }
 0x202   : > { %780 = dma.done.wait (!%p671_p3), %s510_s23, 512  }
 0x203   : > { %782 = vsyncadd (!%p671_p3), %s510_s23, 4294966784  ;;  %s15_s14 = sadd.s32 1, %s805_s14   ;;  %s1009_s9 = smov %s789_s10 }
 0x204   : > { %p12_p5 = scmp.ge.s32.totalorder %s15_s14, 4   ;;  %s1010_s10 = smov %s793_s11 }
 0x205   : > { %s1011_s11 = smov %s880_s22  ;;  %s1012_s12 = smov %s801_s13 }
 0x206   : > { %s1013_s13 = smov %s1015_s17  ;;  %14 = sbr.rel (!%p12_p5) target bundleno = 4 (0x4), region = 66 }
 0x20d   :  { %515 = vsyncpa [#allocation4], 1 }
 0x20e   :  { %517 = vsyncpa [#allocation4 + $0x1], 1 }

</bundles_post_ra>
